<compile_context>
chip_gen: v6e
topology: v6e:2x2x1
jax: 0.10.0
libtpu: 0.0.40
codegen_flags: <defaults>
</compile_context>

<pallas_src>
import jax
import jax.numpy as jnp
from jax.experimental import pallas as pl
from jax.experimental.pallas import tpu as pltpu

EPS = 1e-5


# ----------------------------- in-kernel helpers --------------------------- #

def _layernorm(h, gamma, beta):
    # One-pass f32 LayerNorm; rsqrt lands on the EUP slot, gamma folded into
    # the per-row scale so (h - mu) is multiplied exactly once.
    mu = jnp.mean(h, axis=-1, keepdims=True)
    var = jnp.mean(h * h, axis=-1, keepdims=True) - mu * mu
    scale = jax.lax.rsqrt(var + EPS) * gamma
    return (h - mu) * scale + beta


# ----------------------------- kernels ------------------------------------- #

def append_kernel(x_ref, w_ref, v_ref, o_ref):
    # out = layer_norm(relu(append_fc(x)))
    # v_ref rows: [0]=append_fc bias, [1]=ln gamma, [2]=ln beta   (f32)
    x = x_ref[...].astype(w_ref.dtype)
    h = jnp.dot(x, w_ref[...], preferred_element_type=jnp.float32)
    h = jnp.maximum(h + v_ref[0:1, :], 0.0)
    o_ref[...] = _layernorm(h, v_ref[1:2, :], v_ref[2:3, :]).astype(o_ref.dtype)


def resb4_kernel(x_ref, wx_ref, w2b_ref, v_ref, o_ref):
    # Fused form of:
    #   out = zero_out2(layer_norm(relu(res_fc(zero_out1(x)))))
    #   y   = block(x + out)                        (block == Linear)
    # wx  = [w1 | Wb^T]  (F, 2F),  w1 = Wz1^T @ Wr^T   -> single x-path matmul
    # w2b = Wz2^T @ Wb^T (F, F)
    # v_ref rows: [0]=b1, [1]=ln gamma, [2]=ln beta, [3]=b_tail   (f32)
    F = o_ref.shape[-1]
    xc = x_ref[...].astype(wx_ref.dtype)
    h = jnp.dot(xc, wx_ref[...], preferred_element_type=jnp.float32)   # (bm, 2F)
    out = jnp.maximum(h[:, :F] + v_ref[0:1, :], 0.0)
    out = _layernorm(out, v_ref[1:2, :], v_ref[2:3, :])
    y = (h[:, F:]
         + jnp.dot(out.astype(w2b_ref.dtype), w2b_ref[...],
                   preferred_element_type=jnp.float32)
         + v_ref[3:4, :])
    o_ref[...] = y.astype(o_ref.dtype)


# ----------------------------- wrappers ------------------------------------ #

def _round_up(n, m):
    return ((n + m - 1) // m) * m


def _default_max_bm():
    # v5e: 4x128^2 MXU, single vector-store slot -> bm=128 halves live f32
    # state with no MXU-utilization loss.
    try:
        kind = jax.devices()[0].device_kind.lower()
    except Exception:
        return 256
    if "v5e" in kind or "v5 lite" in kind or "v5lite" in kind:
        return 128
    return 256


def _choose_bm(B, max_bm):
    # Multiple of 16 so the in-kernel f32->bf16 cast packs sublanes cleanly.
    # For B >= 32, force >=2 grid steps so the "parallel" batch axis can be
    # sharded across v7x's two TensorCores.
    if B >= 32:
        bm = _round_up(-(-B // 2), 16)
    else:
        bm = _round_up(max(B, 1), 16)
    return max(16, min(max_bm, bm))


def _pad_rows(x, bm):
    B = x.shape[0]
    Bp = _round_up(B, bm)
    if Bp != B:
        x = jnp.pad(x, ((0, Bp - B), (0, 0)))
    return x, B, Bp


def _vmem_limit(bm, F, weight_bytes):
    # 2x double-buffered (bm,F) f32 in + out tiles, resident weights/vec, slack.
    footprint = 4 * bm * F * 4 + 2 * weight_bytes + (2 << 20)
    return int(max(32 << 20, min(64 << 20, 2 * footprint)))


def _forward(kernel, xp, weights, vec, *, bm, F, out_dtype, flops, bytes_accessed):
    Bp = xp.shape[0]
    grid = (Bp // bm,)
    weight_bytes = sum(int(w.nbytes) for w in weights) + int(vec.nbytes)

    def build(single_buffer):
        def inv_spec(shape):
            # Grid-invariant block: constant index_map; single-buffer it so the
            # pipeline does not allocate a pointless second VMEM copy.
            if single_buffer:
                return pl.BlockSpec(shape, lambda i: (0, 0),
                                    pipeline_mode=pl.Buffered(1))
            return pl.BlockSpec(shape, lambda i: (0, 0))

        row_spec = pl.BlockSpec((bm, F), lambda i: (i, 0))
        return pl.pallas_call(
            kernel,
            out_shape=jax.ShapeDtypeStruct((Bp, F), out_dtype),
            grid=grid,
            in_specs=[row_spec]
                     + [inv_spec(w.shape) for w in weights]
                     + [inv_spec(vec.shape)],
            out_specs=row_spec,
            compiler_params=pltpu.CompilerParams(
                dimension_semantics=("parallel",),
                vmem_limit_bytes=_vmem_limit(bm, F, weight_bytes)),
            cost_estimate=pl.CostEstimate(
                flops=int(flops), transcendentals=int(Bp),
                bytes_accessed=int(bytes_accessed)),
        )

    args = (xp, *weights, vec)
    try:
        return build(single_buffer=True)(*args)
    except Exception:
        # jax version without pipeline_mode / Buffered(1): default buffering.
        return build(single_buffer=False)(*args)


def augmented_block_append(x, p, *, bm=None, max_bm=None,
                           weight_dtype=jnp.bfloat16):
    B, F = x.shape
    if max_bm is None:
        max_bm = _default_max_bm()
    if bm is None:
        bm = _choose_bm(B, max_bm)
    xp, B, Bp = _pad_rows(x, bm)

    w = p["append_fc_w"].T.astype(weight_dtype)                       # (F_in, F_out)
    vec = jnp.stack([p["append_fc_b"], p["ln_g"], p["ln_b"]]).astype(jnp.float32)

    flops = 2 * Bp * F * F + 8 * Bp * F
    bytes_acc = 2 * Bp * F * 4 + w.nbytes + vec.nbytes
    out = _forward(append_kernel, xp, (w,), vec, bm=bm, F=F, out_dtype=x.dtype,
                   flops=flops, bytes_accessed=bytes_acc)
    return out[:B] if Bp != B else out


def augmented_block_resb4(x, p, *, bm=None, max_bm=None,
                          weight_dtype=jnp.bfloat16):
    B, F = x.shape
    if max_bm is None:
        max_bm = _default_max_bm()
    if bm is None:
        bm = _choose_bm(B, max_bm)
    xp, B, Bp = _pad_rows(x, bm)

    # One-time algebraic fusion of back-to-back Linear layers (f32 math, then
    # a single cast to bf16 for the MXU).  NOTE: if params change every step
    # (training), precompute / cache these fused weights outside the step so
    # the two FxFxF fusion matmuls do not run on every call.
    f32 = jnp.float32
    wz1, bz1 = p["zero_out1_w"].astype(f32), p["zero_out1_b"].astype(f32)
    wr, br = p["res_fc_w"].astype(f32), p["res_fc_b"].astype(f32)
    wz2, bz2 = p["zero_out2_w"].astype(f32), p["zero_out2_b"].astype(f32)
    wb, bb = p["block_w"].astype(f32), p["block_b"].astype(f32)

    w1 = wz1.T @ wr.T                                 # zero_out1 -> res_fc
    b1 = bz1 @ wr.T + br
    w2b = (wz2.T @ wb.T).astype(weight_dtype)         # zero_out2 -> block
    b_tail = bz2 @ wb.T + bb
    # Merge both x-path matmuls into one wide weight: x streamed through the
    # MXU once; for F=128 the packed N=256 fills the 2x256 MXU on v6e/v7x.
    wx = jnp.concatenate([w1, wb.T], axis=1).astype(weight_dtype)     # (F, 2F)

    vec = jnp.stack([b1, p["ln_g"].astype(f32), p["ln_b"].astype(f32), b_tail])

    flops = 6 * Bp * F * F + 12 * Bp * F
    bytes_acc = 2 * Bp * F * 4 + wx.nbytes + w2b.nbytes + vec.nbytes
    out = _forward(resb4_kernel, xp, (wx, w2b), vec, bm=bm, F=F,
                   out_dtype=x.dtype, flops=flops, bytes_accessed=bytes_acc)
    return out[:B] if Bp != B else out


# ----------------------------- reference (pure JAX, f32) ------------------- #

def _ref_layernorm(h, gamma, beta):
    mu = jnp.mean(h, axis=-1, keepdims=True)
    var = jnp.mean((h - mu) ** 2, axis=-1, keepdims=True)
    return (h - mu) / jnp.sqrt(var + EPS) * gamma + beta


def ref_append(x, p):
    h = x @ p["append_fc_w"].T + p["append_fc_b"]
    h = jnp.maximum(h, 0.0)
    return _ref_layernorm(h, p["ln_g"], p["ln_b"])


def ref_resb4(x, p):
    out = x @ p["zero_out1_w"].T + p["zero_out1_b"]
    out = out @ p["res_fc_w"].T + p["res_fc_b"]
    out = jnp.maximum(out, 0.0)
    out = _ref_layernorm(out, p["ln_g"], p["ln_b"])
    out = out @ p["zero_out2_w"].T + p["zero_out2_b"]
    return (x + out) @ p["block_w"].T + p["block_b"]


# ----------------------------- main ---------------------------------------- #

if __name__ == "__main__":
    B, F = 8, 128  # batch, in_features (== block.in_features)
    key = jax.random.PRNGKey(0)
    ks = jax.random.split(key, 14)
    scale = 1.0 / jnp.sqrt(F)

    def u(k, s):
        return jax.random.uniform(k, s, jnp.float32, -scale, scale)

    # Fresh AugmentedBlock init (PyTorch Linear weight shape is (out, in);
    # zero_out1 / zero_out2 zero-init per _zero_init; LayerNorm default init).
    params = {
        "append_fc_w": u(ks[0], (F, F)), "append_fc_b": u(ks[1], (F,)),
        "res_fc_w":    u(ks[2], (F, F)), "res_fc_b":    u(ks[3], (F,)),
        "zero_out1_w": jnp.zeros((F, F), jnp.float32),
        "zero_out1_b": jnp.zeros((F,), jnp.float32),
        "zero_out2_w": jnp.zeros((F, F), jnp.float32),
        "zero_out2_b": jnp.zeros((F,), jnp.float32),
        "ln_g": jnp.ones((F,), jnp.float32),
        "ln_b": jnp.zeros((F,), jnp.float32),
        "block_w": u(ks[4], (F, F)), "block_b": u(ks[5], (F,)),
    }
    x = jax.random.normal(ks[6], (B, F), jnp.float32)

    # bf16 matmuls with f32 accumulation -> loosened tolerance vs f32 reference.
    TOL = dict(atol=3e-2, rtol=3e-2)

    y_append = jax.block_until_ready(augmented_block_append(x, params))
    y_resb4 = jax.block_until_ready(augmented_block_resb4(x, params))
    assert jnp.allclose(y_append, ref_append(x, params), **TOL)
    assert jnp.allclose(y_resb4, ref_resb4(x, params), **TOL)

    # "Trained" state with non-zero zero_out layers: exercises the wrapper-side
    # algebraic fusion (zero_out1@res_fc, zero_out2@block) non-trivially.
    trained = dict(params)
    trained["zero_out1_w"] = u(ks[7], (F, F))
    trained["zero_out1_b"] = u(ks[8], (F,))
    trained["zero_out2_w"] = u(ks[9], (F, F))
    trained["zero_out2_b"] = u(ks[10], (F,))
    y_trained = jax.block_until_ready(augmented_block_resb4(x, trained))
    assert jnp.allclose(y_trained, ref_resb4(x, trained), **TOL)

    # Batch not a multiple of the tile: exercises the pad + slice-back path.
    x_odd = jax.random.normal(ks[11], (B + 3, F), jnp.float32)
    y_odd = jax.block_until_ready(augmented_block_append(x_odd, params))
    assert jnp.allclose(y_odd, ref_append(x_odd, params), **TOL)

    # Mid-size batch: exercises the >=2-grid-step path (2 TC sharding on v7x).
    x_mid = jax.random.normal(ks[12], (40, F), jnp.float32)
    y_mid_a = jax.block_until_ready(augmented_block_append(x_mid, params))
    y_mid_r = jax.block_until_ready(augmented_block_resb4(x_mid, trained))
    assert jnp.allclose(y_mid_a, ref_append(x_mid, params), **TOL)
    assert jnp.allclose(y_mid_r, ref_resb4(x_mid, trained), **TOL)

    print("KERNEL_OK")
</pallas_src>

<mosaic_0001>
module attributes {stable_mosaic.version = 11 : i64} {
  func.func @append_kernel(%arg0: i32, %arg1: memref<16x128xf32, #tpu.memory_space<vmem>>, %arg2: memref<128x128xbf16, #tpu.memory_space<vmem>>, %arg3: memref<3x128xf32, #tpu.memory_space<vmem>>, %arg4: memref<16x128xf32, #tpu.memory_space<vmem>>) attributes {dimension_semantics = [#tpu.dimension_semantics<parallel>], iteration_bounds = array<i64: 1>, scalar_prefetch = 0 : i64, scratch_operands = 0 : i64, tpu.core_type = #tpu.core_type<tc>, window_params = [{transform_indices = @transform_0, window_bounds = array<i64: 16, 128>}, {pipeline_mode = #tpu.pipeline_mode<synchronous>, transform_indices = @transform_1, window_bounds = array<i64: 128, 128>}, {pipeline_mode = #tpu.pipeline_mode<synchronous>, transform_indices = @transform_2, window_bounds = array<i64: 3, 128>}, {transform_indices = @transform_3, window_bounds = array<i64: 16, 128>}]} {
    %c0 = arith.constant 0 : index
    %c0_0 = arith.constant 0 : index
    %0 = vector.load %arg1[%c0, %c0_0] : memref<16x128xf32, #tpu.memory_space<vmem>>, vector<16x128xf32>
    %1 = arith.truncf %0 : vector<16x128xf32> to vector<16x128xbf16>
    %c0_1 = arith.constant 0 : index
    %c0_2 = arith.constant 0 : index
    %2 = vector.load %arg2[%c0_1, %c0_2] : memref<128x128xbf16, #tpu.memory_space<vmem>>, vector<128x128xbf16>
    %cst = arith.constant dense<0.000000e+00> : vector<16x128xf32>
    %3 = tpu.matmul %1, %2, %cst {dimension_numbers = #tpu.dot_dimension_numbers<[1], [0], [0], [1], [0, 0, 1, 1], [], []>} : vector<16x128xbf16>, vector<128x128xbf16>, vector<16x128xf32> -> vector<16x128xf32>
    %c0_3 = arith.constant 0 : index
    %c0_4 = arith.constant 0 : index
    %4 = vector.load %arg3[%c0_3, %c0_4] : memref<3x128xf32, #tpu.memory_space<vmem>>, vector<1x128xf32>
    %5 = vector.broadcast %4 : vector<1x128xf32> to vector<16x128xf32>
    %6 = arith.addf %3, %5 : vector<16x128xf32>
    %cst_5 = arith.constant 0.000000e+00 : f32
    %7 = vector.broadcast %cst_5 : f32 to vector<16x128xf32>
    %8 = arith.maximumf %6, %7 : vector<16x128xf32>
    %c1 = arith.constant 1 : index
    %c0_6 = arith.constant 0 : index
    %9 = vector.load %arg3[%c1, %c0_6] : memref<3x128xf32, #tpu.memory_space<vmem>>, vector<1x128xf32>
    %c2 = arith.constant 2 : index
    %c0_7 = arith.constant 0 : index
    %10 = vector.load %arg3[%c2, %c0_7] : memref<3x128xf32, #tpu.memory_space<vmem>>, vector<1x128xf32>
    %cst_8 = arith.constant dense<0.000000e+00> : vector<16xf32>
    %11 = vector.multi_reduction <add>, %8, %cst_8 [1] : vector<16x128xf32> to vector<16xf32>
    %12 = vector.shape_cast %11 : vector<16xf32> to vector<16x1xf32>
    %cst_9 = arith.constant 1.280000e+02 : f32
    %13 = vector.broadcast %cst_9 : f32 to vector<16x1xf32>
    %14 = arith.divf %12, %13 : vector<16x1xf32>
    %15 = arith.mulf %8, %8 : vector<16x128xf32>
    %cst_10 = arith.constant dense<0.000000e+00> : vector<16xf32>
    %16 = vector.multi_reduction <add>, %15, %cst_10 [1] : vector<16x128xf32> to vector<16xf32>
    %17 = vector.shape_cast %16 : vector<16xf32> to vector<16x1xf32>
    %cst_11 = arith.constant 1.280000e+02 : f32
    %18 = vector.broadcast %cst_11 : f32 to vector<16x1xf32>
    %19 = arith.divf %17, %18 : vector<16x1xf32>
    %20 = arith.mulf %14, %14 : vector<16x1xf32>
    %21 = arith.subf %19, %20 : vector<16x1xf32>
    %cst_12 = arith.constant 9.99999974E-6 : f32
    %22 = vector.broadcast %cst_12 : f32 to vector<16x1xf32>
    %23 = arith.addf %21, %22 : vector<16x1xf32>
    %24 = math.rsqrt %23 : vector<16x1xf32>
    %25 = vector.broadcast %24 : vector<16x1xf32> to vector<16x128xf32>
    %26 = vector.broadcast %9 : vector<1x128xf32> to vector<16x128xf32>
    %27 = arith.mulf %25, %26 : vector<16x128xf32>
    %28 = vector.broadcast %14 : vector<16x1xf32> to vector<16x128xf32>
    %29 = arith.subf %8, %28 : vector<16x128xf32>
    %30 = arith.mulf %29, %27 : vector<16x128xf32>
    %31 = vector.broadcast %10 : vector<1x128xf32> to vector<16x128xf32>
    %32 = arith.addf %30, %31 : vector<16x128xf32>
    %c0_13 = arith.constant 0 : index
    %c0_14 = arith.constant 0 : index
    %33 = vector.load %arg4[%c0_13, %c0_14] : memref<16x128xf32, #tpu.memory_space<vmem>>, vector<16x128xf32>
    tpu.vector_store %arg4[%c0_13, %c0_14], %32 {strides = array<i32>} : memref<16x128xf32, #tpu.memory_space<vmem>>, vector<16x128xf32>,
    return
  }
  func.func @transform_0(%arg0: i32) -> (i32, i32) {
    %c0_i32 = arith.constant 0 : i32
    %c0_i32_0 = arith.constant 0 : i32
    return %arg0, %c0_i32 : i32, i32
  }
  func.func @transform_1(%arg0: i32) -> (i32, i32) {
    %c0_i32 = arith.constant 0 : i32
    %c0_i32_0 = arith.constant 0 : i32
    %c0_i32_1 = arith.constant 0 : i32
    return %c0_i32, %c0_i32_0 : i32, i32
  }
  func.func @transform_2(%arg0: i32) -> (i32, i32) {
    %c0_i32 = arith.constant 0 : i32
    %c0_i32_0 = arith.constant 0 : i32
    %c0_i32_1 = arith.constant 0 : i32
    return %c0_i32, %c0_i32_0 : i32, i32
  }
  func.func @transform_3(%arg0: i32) -> (i32, i32) {
    %c0_i32 = arith.constant 0 : i32
    %c0_i32_0 = arith.constant 0 : i32
    return %arg0, %c0_i32 : i32, i32
  }
}

module attributes {stable_mosaic.version = 11 : i64} {
  func.func @append_kernel(%arg0: i32, %arg1: memref<16x128xf32, #tpu.memory_space<vmem>>, %arg2: memref<128x128xbf16, #tpu.memory_space<vmem>>, %arg3: memref<3x128xf32, #tpu.memory_space<vmem>>, %arg4: memref<16x128xf32, #tpu.memory_space<vmem>>) attributes {dimension_semantics = [#tpu.dimension_semantics<parallel>], iteration_bounds = array<i64: 1>, scalar_prefetch = 0 : i64, scratch_operands = 0 : i64, tpu.core_type = #tpu.core_type<tc>, window_params = [{transform_indices = @transform_0, window_bounds = array<i64: 16, 128>}, {pipeline_mode = #tpu.pipeline_mode<synchronous>, transform_indices = @transform_1, window_bounds = array<i64: 128, 128>}, {pipeline_mode = #tpu.pipeline_mode<synchronous>, transform_indices = @transform_2, window_bounds = array<i64: 3, 128>}, {transform_indices = @transform_3, window_bounds = array<i64: 16, 128>}]} {
    %c0 = arith.constant 0 : index
    %c0_0 = arith.constant 0 : index
    %0 = vector.load %arg1[%c0, %c0_0] : memref<16x128xf32, #tpu.memory_space<vmem>>, vector<16x128xf32>
    %1 = arith.truncf %0 : vector<16x128xf32> to vector<16x128xbf16>
    %c0_1 = arith.constant 0 : index
    %c0_2 = arith.constant 0 : index
    %2 = vector.load %arg2[%c0_1, %c0_2] : memref<128x128xbf16, #tpu.memory_space<vmem>>, vector<128x128xbf16>
    %cst = arith.constant dense<0.000000e+00> : vector<16x128xf32>
    %3 = tpu.matmul %1, %2, %cst {dimension_numbers = #tpu.dot_dimension_numbers<[1], [0], [0], [1], [0, 0, 1, 1], [], []>} : vector<16x128xbf16>, vector<128x128xbf16>, vector<16x128xf32> -> vector<16x128xf32>
    %c0_3 = arith.constant 0 : index
    %c0_4 = arith.constant 0 : index
    %4 = vector.load %arg3[%c0_3, %c0_4] : memref<3x128xf32, #tpu.memory_space<vmem>>, vector<1x128xf32>
    %5 = vector.broadcast %4 : vector<1x128xf32> to vector<16x128xf32>
    %6 = arith.addf %3, %5 : vector<16x128xf32>
    %cst_5 = arith.constant 0.000000e+00 : f32
    %7 = vector.broadcast %cst_5 : f32 to vector<16x128xf32>
    %8 = arith.maximumf %6, %7 : vector<16x128xf32>
    %c1 = arith.constant 1 : index
    %c0_6 = arith.constant 0 : index
    %9 = vector.load %arg3[%c1, %c0_6] : memref<3x128xf32, #tpu.memory_space<vmem>>, vector<1x128xf32>
    %c2 = arith.constant 2 : index
    %c0_7 = arith.constant 0 : index
    %10 = vector.load %arg3[%c2, %c0_7] : memref<3x128xf32, #tpu.memory_space<vmem>>, vector<1x128xf32>
    %cst_8 = arith.constant dense<0.000000e+00> : vector<16xf32>
    %11 = vector.multi_reduction <add>, %8, %cst_8 [1] : vector<16x128xf32> to vector<16xf32>
    %12 = vector.shape_cast %11 : vector<16xf32> to vector<16x1xf32>
    %cst_9 = arith.constant 1.280000e+02 : f32
    %13 = vector.broadcast %cst_9 : f32 to vector<16x1xf32>
    %14 = arith.divf %12, %13 : vector<16x1xf32>
    %15 = arith.mulf %8, %8 : vector<16x128xf32>
    %cst_10 = arith.constant dense<0.000000e+00> : vector<16xf32>
    %16 = vector.multi_reduction <add>, %15, %cst_10 [1] : vector<16x128xf32> to vector<16xf32>
    %17 = vector.shape_cast %16 : vector<16xf32> to vector<16x1xf32>
    %cst_11 = arith.constant 1.280000e+02 : f32
    %18 = vector.broadcast %cst_11 : f32 to vector<16x1xf32>
    %19 = arith.divf %17, %18 : vector<16x1xf32>
    %20 = arith.mulf %14, %14 : vector<16x1xf32>
    %21 = arith.subf %19, %20 : vector<16x1xf32>
    %cst_12 = arith.constant 9.99999974E-6 : f32
    %22 = vector.broadcast %cst_12 : f32 to vector<16x1xf32>
    %23 = arith.addf %21, %22 : vector<16x1xf32>
    %24 = math.rsqrt %23 : vector<16x1xf32>
    %25 = vector.broadcast %24 : vector<16x1xf32> to vector<16x128xf32>
    %26 = vector.broadcast %9 : vector<1x128xf32> to vector<16x128xf32>
    %27 = arith.mulf %25, %26 : vector<16x128xf32>
    %28 = vector.broadcast %14 : vector<16x1xf32> to vector<16x128xf32>
    %29 = arith.subf %8, %28 : vector<16x128xf32>
    %30 = arith.mulf %29, %27 : vector<16x128xf32>
    %31 = vector.broadcast %10 : vector<1x128xf32> to vector<16x128xf32>
    %32 = arith.addf %30, %31 : vector<16x128xf32>
    %c0_13 = arith.constant 0 : index
    %c0_14 = arith.constant 0 : index
    %33 = vector.load %arg4[%c0_13, %c0_14] : memref<16x128xf32, #tpu.memory_space<vmem>>, vector<16x128xf32>
    tpu.vector_store %arg4[%c0_13, %c0_14], %32 {strides = array<i32>} : memref<16x128xf32, #tpu.memory_space<vmem>>, vector<16x128xf32>,
    return
  }
  func.func @transform_0(%arg0: i32) -> (i32, i32) {
    %c0_i32 = arith.constant 0 : i32
    %c0_i32_0 = arith.constant 0 : i32
    return %arg0, %c0_i32 : i32, i32
  }
  func.func @transform_1(%arg0: i32) -> (i32, i32) {
    %c0_i32 = arith.constant 0 : i32
    %c0_i32_0 = arith.constant 0 : i32
    %c0_i32_1 = arith.constant 0 : i32
    return %c0_i32, %c0_i32_0 : i32, i32
  }
  func.func @transform_2(%arg0: i32) -> (i32, i32) {
    %c0_i32 = arith.constant 0 : i32
    %c0_i32_0 = arith.constant 0 : i32
    %c0_i32_1 = arith.constant 0 : i32
    return %c0_i32, %c0_i32_0 : i32, i32
  }
  func.func @transform_3(%arg0: i32) -> (i32, i32) {
    %c0_i32 = arith.constant 0 : i32
    %c0_i32_0 = arith.constant 0 : i32
    return %arg0, %c0_i32 : i32, i32
  }
}

</mosaic_0001>

<bundles_post_ra>
// kernel: tpu_custom_call.1
= control target key start
LH: loop header
LB: loop body
LE: loop exit
PB: predicated region body
PF: predicated region fallthrough
CT: control target
= control target key end

     0   :  { %8 = vsyncpa [#allocation3], 0  ;;  %s427_s0 = inlined_call_operand.hbm [shape: f32[16,128], index: 0, kind: input, shape index: {}]   ;;  %s428_s1 = inlined_call_operand.hbm [shape: bf16[128,128], index: 1, kind: input, shape index: {}]   ;;  %s429_s2 = inlined_call_operand.hbm [shape: f32[3,128], index: 2, kind: input, shape index: {}]   ;;  %s430_s3 = inlined_call_operand.hbm [shape: f32[16,128], index: 3, kind: output, shape index: {}]  }
   0x1   :  { %9 = vsyncpa [#allocation6], 0 }
   0x2   :  { %10 = vsyncpa [#allocation4], 0  ;;  %s379_s12 = smov [#allocation5]  }
   0x3   :  { %s28_s13 = sshll.u32 %s379_s12, 4  ;;  %s29_s13 = int_to_ptr.vmem [resolvable:$true] %s28_s13 }
   0x4   :  { %s301_s14 = scalar_lea.vmem %s29_s13, 1024  ;;  %p306_p1 = scmp.lt.s32.totalorder %s29_s13, %s29_s13 }
   0x5   :  { %p302_p0 = scmp.ne.s32.totalorder %s29_s13, %s301_s14  ;;  %p307_p2 = scmp.lt.s32.totalorder %s301_s14, %s301_s14 }
   0x7   :  { %p308_p3 = por %p307_p2, %p306_p1 }
   0x9   :  { %p309_p4 = pnand %p308_p3, %p302_p0 }
   0xb   :  { %312 = shalt.err (!%p309_p4)
}
   0xc   :  { %s380_s15 = smov 64   ;;  %s381_s16 = smov 4  }
   0xd   :  { %34 = dma.hbm_to_vmem [thread:$0]  %s428_s1, 1024, %s29_s13, [#allocation6], %s380_s15, %s380_s15, %s381_s16  }
   0xe   :  { %s382_s19 = smov [#allocation2]  }
   0xf   :  { %s16_s20 = sshll.u32 %s382_s19, 4  ;;  %s17_s20 = int_to_ptr.vmem [resolvable:$true] %s16_s20 }
  0x10   :  { %s321_s21 = scalar_lea.vmem %s17_s20, 256  ;;  %p326_p6 = scmp.lt.s32.totalorder %s17_s20, %s17_s20 }
  0x11   :  { %p322_p5 = scmp.ne.s32.totalorder %s17_s20, %s321_s21  ;;  %p327_p7 = scmp.lt.s32.totalorder %s321_s21, %s321_s21 }
  0x13   :  { %p328_p8 = por %p327_p7, %p326_p6 }
  0x15   :  { %p329_p9 = pnand %p328_p8, %p322_p5 }
  0x17   :  { %332 = shalt.err (!%p329_p9)
}
  0x18   :  { %s383_s22 = smov 128   ;;  %s384_s23 = smov 8  }
  0x19   :  { %22 = dma.hbm_to_vmem [thread:$0]  %s427_s0, 256, %s17_s20, [#allocation3], %s383_s22, %s383_s22, %s384_s23  }
  0x1a   :  { %s385_s1 = smov [#allocation7]  }
  0x1b   :  { %s41_s26 = sshll.u32 %s385_s1, 4  ;;  %s42_s26 = int_to_ptr.vmem [resolvable:$true] %s41_s26 }
  0x1c   :  { %s341_s27 = scalar_lea.vmem %s42_s26, 64  ;;  %p346_p11 = scmp.lt.s32.totalorder %s42_s26, %s42_s26 }
  0x1d   :  { %p342_p10 = scmp.ne.s32.totalorder %s42_s26, %s341_s27  ;;  %p347_p12 = scmp.lt.s32.totalorder %s341_s27, %s341_s27 }
  0x1f   :  { %p348_p13 = por %p347_p12, %p346_p11 }
  0x21   :  { %p349_p0 = pnand %p348_p13, %p342_p10 }
  0x23   :  { %352 = shalt.err (!%p349_p0)
}
  0x24   :  { %44 = dma.hbm_to_vmem [thread:$0]  %s429_s2, 64, %s42_s26, [#allocation6]  }
  0x25   :  { %373 = dma.done.wait [#allocation3], 256  }
  0x26   :  { %374 = vsyncadd [#allocation3], 4294967040 }
  0x27   :  { %375 = dma.done.wait [#allocation6], 1088  }
  0x28   :  { %376 = vsyncadd [#allocation6], 4294966208  ;;  %v386_v0 = vmov 0.0   ;;  %vm387_vm0 = vmmov 0   ;;  %v281_v1 = vld [vmem:[#allocation5 + $0x38] sm:$0xff]   ;;  %v282_v2 = vld [vmem:[#allocation5 + $0x30] sm:$0xff]  }
  0x29   :  { %251 = vmatprep.subr.bf16.mxu0 %v386_v0  ;;  %267 = vmatprep.mubr.msk.bf16.mxu0 %vm387_vm0, %v386_v0  ;;  %v283_v3 = vld [vmem:[#allocation5 + $0x28] sm:$0xff]   ;;  %v284_v4 = vld [vmem:[#allocation5 + $0x20] sm:$0xff]   ;;  %v285_v5 = vld [vmem:[#allocation5 + $0x18] sm:$0xff]   ;;  %s388_s0 = smov [#allocation8]  }
  0x2a   :  { %252 = vmatpush3.bf16.msra.mxu0 %v281_v1  ;;  %v286_v6 = vld [vmem:[#allocation5 + $0x10] sm:$0xff]   ;;  %v287_v7 = vld [vmem:[#allocation5 + $0x8] sm:$0xff]   ;;  %v288_v8 = vld [vmem:[#allocation5] sm:$0xff]   ;;  %s218_s2 = sshll.u32 %s388_s0, 4  ;;  %s219_s2 = int_to_ptr.vmem [resolvable:$true] %s218_s2 }
  0x2b   :  { %253 = vmatprep.subr.bf16.mxu0 %v386_v0  ;;  %v55_v9 = vld [vmem:[#allocation2] sm:$0xff]  ;;  %v56_v10 = vld [vmem:[#allocation2 + $0x8] sm:$0xff]  ;;  %v231_v12 = vld [vmem:[#allocation7] ss:$0 sm:$0xff]  ;;  %s353_s30 = scalar_lea.vmem %s219_s2, 256  ;;  %p358_p2 = scmp.lt.s32.totalorder %s219_s2, %s219_s2 }
  0x2c   :  { %v57_v11 = vpack.c.bf16 %v56_v10, %v55_v9  ;;  %v240_v37 = vld [vmem:[#allocation7 + $0x1] ss:$0 sm:$0xff]  ;;  %v241_v41 = vld [vmem:[#allocation7 + $0x2] ss:$0 sm:$0xff]  ;;  %p354_p1 = scmp.ne.s32.totalorder %s219_s2, %s353_s30  ;;  %p359_p3 = scmp.lt.s32.totalorder %s353_s30, %s353_s30 }
  0x2e   :  { %254 = vmatpush3.bf16.msra.mxu0 %v282_v2  ;;  %p360_p4 = por %p359_p3, %p358_p2 }
  0x2f   :  { %255 = vmatprep.subr.bf16.mxu0 %v386_v0 }
  0x30   :  { %p361_p5 = pnand %p360_p4, %p354_p1 }
  0x32   :  { %256 = vmatpush3.bf16.msra.mxu0 %v283_v3 }
  0x33   :  { %257 = vmatprep.subr.bf16.mxu0 %v386_v0 }
  0x36   :  { %258 = vmatpush3.bf16.msra.mxu0 %v284_v4 }
  0x37   :  { %259 = vmatprep.subr.bf16.mxu0 %v386_v0 }
  0x3a   :  { %260 = vmatpush3.bf16.msra.mxu0 %v285_v5 }
  0x3b   :  { %261 = vmatprep.subr.bf16.mxu0 %v386_v0 }
  0x3e   :  { %262 = vmatpush3.bf16.msra.mxu0 %v286_v6 }
  0x3f   :  { %263 = vmatprep.subr.bf16.mxu0 %v386_v0 }
  0x42   :  { %264 = vmatpush3.bf16.msra.mxu0 %v287_v7 }
  0x43   :  { %265 = vmatprep.subr.bf16.mxu0 %v386_v0 }
  0x46   :  { %266 = vmatpush3.bf16.msra.mxu0 %v288_v8 }
  0x49   :  { %268 = vmatmul.mubr.bf16.vlgmr.msra.gmra.mxu0 %v57_v11 }
 0x109   :  { %v161_v13 = vpop.f32.mrf.mxu0 }
 0x10a   :  { %v162_v14 = vadd.f32 %v231_v12, %v161_v13 }
 0x10b   :  { %v269_v15 = vpop.f32.mrf.mxu0 }
 0x10c   :  { %v168_v16 = vmax.f32 %v162_v14, 0.0 }
 0x10d   :  { %v164_v17 = vpop.f32.mrf.mxu0 }
 0x10e   :  { %v165_v18 = vadd.f32 %v231_v12, %v164_v17  ;;  %172 = vadd.xlane.f32.xlu0 %v168_v16  ;;  %v179_v19 = vmul.f32 %v168_v16, %v168_v16 }
 0x10f   :  { %v270_v20 = vpop.f32.mrf.mxu0 }
 0x110   :  { %v169_v21 = vmax.f32 %v165_v18, 0.0  ;;  %181 = vadd.xlane.f32.xlu1 %v179_v19 }
 0x112   :  { %174 = vadd.xlane.f32.xlu0 %v169_v21  ;;  %v180_v22 = vmul.f32 %v169_v21, %v169_v21 }
 0x114   :  { %183 = vadd.xlane.f32.xlu1 %v180_v22 }
 0x197   :  { %v173_v23 = vpop.xlane.xlu0 %172 }
 0x198   :  { %v177_v24 = vmul.f32 0.0078125, %v173_v23 }
 0x199   :  { %v182_v25 = vpop.xlane.xlu1 %181 }
 0x19a   :  { %v187_v26 = vmul.f32 %v177_v24, %v177_v24  ;;  %v185_v27 = vmul.f32 0.0078125, %v182_v25  ;;  %v201_v39 = vsub.f32 %v168_v16, %v177_v24 }
 0x19b   :  { %v175_v28 = vpop.xlane.xlu0 %174 }
 0x19c   :  { %v189_v29 = vsub.f32 %v185_v27, %v187_v26  ;;  %v178_v30 = vmul.f32 0.0078125, %v175_v28 }
 0x19d   :  { %v184_v31 = vpop.xlane.xlu1 %183 }
 0x19e   :  { %v191_v32 = vadd.f32 1e-05, %v189_v29  ;;  %v188_v33 = vmul.f32 %v178_v30, %v178_v30  ;;  %v186_v34 = vmul.f32 0.0078125, %v184_v31  ;;  %v202_v44 = vsub.f32 %v169_v21, %v178_v30 }
 0x1a0   :  { %289 = vrsqrt.f32 %v191_v32  ;;  %v190_v35 = vsub.f32 %v186_v34, %v188_v33 }
 0x1a2   :  { %v192_v36 = vadd.f32 1e-05, %v190_v35 }
 0x1a4   :  { %291 = vrsqrt.f32 %v192_v36 }
 0x1ad   :  { %v290_v38 = vpop.eup %289 }
 0x1ae   :  { %v199_v40 = vmul.f32 %v290_v38, %v240_v37 }
 0x1b0   :  { %v203_v42 = vmul.f32 %v201_v39, %v199_v40 }
 0x1b1   :  { %v292_v43 = vpop.eup %291 }
 0x1b2   :  { %v200_v45 = vmul.f32 %v292_v43, %v240_v37  ;;  %v209_v46 = vadd.f32 %v241_v41, %v203_v42 }
 0x1b4   :  { %v204_v47 = vmul.f32 %v202_v44, %v200_v45  ;;  %211 = vst [vmem:[#allocation8] sm:$0xff] %v209_v46 }
 0x1b6   :  { %v210_v48 = vadd.f32 %v241_v41, %v204_v47 }
 0x1b8   :  { %212 = vst [vmem:[#allocation8 + $0x8] sm:$0xff] %v210_v48 }
 0x1b9   :  { %364 = shalt.err (!%p361_p5)
}
 0x1ba   :  { %224 = dma.vmem_to_hbm [thread:$0]  %s219_s2, 256, %s430_s3, [#allocation4], %s383_s22, %s383_s22, %s384_s23  }
 0x1bb   :  { %377 = dma.done.wait [#allocation4], 256  }
 0x1bc   :  { %378 = vsyncadd [#allocation4], 4294967040 }
 0x1bd   :  { %228 = vsyncpa [#allocation3], 1 }
 0x1be   :  { %229 = vsyncpa [#allocation6], 1 }
 0x1bf   :  { %230 = vsyncpa [#allocation4], 1 }

// kernel: tpu_custom_call.1
= control target key start
LH: loop header
LB: loop body
LE: loop exit
PB: predicated region body
PF: predicated region fallthrough
CT: control target
= control target key end

     0   :  { %8 = vsyncpa [#allocation3], 0  ;;  %s427_s0 = inlined_call_operand.hbm [shape: f32[16,128], index: 0, kind: input, shape index: {}]   ;;  %s428_s1 = inlined_call_operand.hbm [shape: bf16[128,128], index: 1, kind: input, shape index: {}]   ;;  %s429_s2 = inlined_call_operand.hbm [shape: f32[3,128], index: 2, kind: input, shape index: {}]   ;;  %s430_s3 = inlined_call_operand.hbm [shape: f32[16,128], index: 3, kind: output, shape index: {}]  }
   0x1   :  { %9 = vsyncpa [#allocation6], 0 }
   0x2   :  { %10 = vsyncpa [#allocation4], 0  ;;  %s379_s12 = smov [#allocation5]  }
   0x3   :  { %s28_s13 = sshll.u32 %s379_s12, 4  ;;  %s29_s13 = int_to_ptr.vmem [resolvable:$true] %s28_s13 }
   0x4   :  { %s301_s14 = scalar_lea.vmem %s29_s13, 1024  ;;  %p306_p1 = scmp.lt.s32.totalorder %s29_s13, %s29_s13 }
   0x5   :  { %p302_p0 = scmp.ne.s32.totalorder %s29_s13, %s301_s14  ;;  %p307_p2 = scmp.lt.s32.totalorder %s301_s14, %s301_s14 }
   0x7   :  { %p308_p3 = por %p307_p2, %p306_p1 }
   0x9   :  { %p309_p4 = pnand %p308_p3, %p302_p0 }
   0xb   :  { %312 = shalt.err (!%p309_p4)
}
   0xc   :  { %s380_s15 = smov 64   ;;  %s381_s16 = smov 4  }
   0xd   :  { %34 = dma.hbm_to_vmem [thread:$0]  %s428_s1, 1024, %s29_s13, [#allocation6], %s380_s15, %s380_s15, %s381_s16  }
   0xe   :  { %s382_s19 = smov [#allocation2]  }
   0xf   :  { %s16_s20 = sshll.u32 %s382_s19, 4  ;;  %s17_s20 = int_to_ptr.vmem [resolvable:$true] %s16_s20 }
  0x10   :  { %s321_s21 = scalar_lea.vmem %s17_s20, 256  ;;  %p326_p6 = scmp.lt.s32.totalorder %s17_s20, %s17_s20 }
  0x11   :  { %p322_p5 = scmp.ne.s32.totalorder %s17_s20, %s321_s21  ;;  %p327_p7 = scmp.lt.s32.totalorder %s321_s21, %s321_s21 }
  0x13   :  { %p328_p8 = por %p327_p7, %p326_p6 }
  0x15   :  { %p329_p9 = pnand %p328_p8, %p322_p5 }
  0x17   :  { %332 = shalt.err (!%p329_p9)
}
  0x18   :  { %s383_s22 = smov 128   ;;  %s384_s23 = smov 8  }
  0x19   :  { %22 = dma.hbm_to_vmem [thread:$0]  %s427_s0, 256, %s17_s20, [#allocation3], %s383_s22, %s383_s22, %s384_s23  }
  0x1a   :  { %s385_s1 = smov [#allocation7]  }
  0x1b   :  { %s41_s26 = sshll.u32 %s385_s1, 4  ;;  %s42_s26 = int_to_ptr.vmem [resolvable:$true] %s41_s26 }
  0x1c   :  { %s341_s27 = scalar_lea.vmem %s42_s26, 64  ;;  %p346_p11 = scmp.lt.s32.totalorder %s42_s26, %s42_s26 }
  0x1d   :  { %p342_p10 = scmp.ne.s32.totalorder %s42_s26, %s341_s27  ;;  %p347_p12 = scmp.lt.s32.totalorder %s341_s27, %s341_s27 }
  0x1f   :  { %p348_p13 = por %p347_p12, %p346_p11 }
  0x21   :  { %p349_p0 = pnand %p348_p13, %p342_p10 }
  0x23   :  { %352 = shalt.err (!%p349_p0)
}
  0x24   :  { %44 = dma.hbm_to_vmem [thread:$0]  %s429_s2, 64, %s42_s26, [#allocation6]  }
  0x25   :  { %373 = dma.done.wait [#allocation3], 256  }
  0x26   :  { %374 = vsyncadd [#allocation3], 4294967040 }
  0x27   :  { %375 = dma.done.wait [#allocation6], 1088  }
  0x28   :  { %376 = vsyncadd [#allocation6], 4294966208  ;;  %v386_v0 = vmov 0.0   ;;  %vm387_vm0 = vmmov 0   ;;  %v281_v1 = vld [vmem:[#allocation5 + $0x38] sm:$0xff]   ;;  %v282_v2 = vld [vmem:[#allocation5 + $0x30] sm:$0xff]  }
  0x29   :  { %251 = vmatprep.subr.bf16.mxu0 %v386_v0  ;;  %267 = vmatprep.mubr.msk.bf16.mxu0 %vm387_vm0, %v386_v0  ;;  %v283_v3 = vld [vmem:[#allocation5 + $0x28] sm:$0xff]   ;;  %v284_v4 = vld [vmem:[#allocation5 + $0x20] sm:$0xff]   ;;  %v285_v5 = vld [vmem:[#allocation5 + $0x18] sm:$0xff]   ;;  %s388_s0 = smov [#allocation8]  }
  0x2a   :  { %252 = vmatpush3.bf16.msra.mxu0 %v281_v1  ;;  %v286_v6 = vld [vmem:[#allocation5 + $0x10] sm:$0xff]   ;;  %v287_v7 = vld [vmem:[#allocation5 + $0x8] sm:$0xff]   ;;  %v288_v8 = vld [vmem:[#allocation5] sm:$0xff]   ;;  %s218_s2 = sshll.u32 %s388_s0, 4  ;;  %s219_s2 = int_to_ptr.vmem [resolvable:$true] %s218_s2 }
  0x2b   :  { %253 = vmatprep.subr.bf16.mxu0 %v386_v0  ;;  %v55_v9 = vld [vmem:[#allocation2] sm:$0xff]  ;;  %v56_v10 = vld [vmem:[#allocation2 + $0x8] sm:$0xff]  ;;  %v231_v12 = vld [vmem:[#allocation7] ss:$0 sm:$0xff]  ;;  %s353_s30 = scalar_lea.vmem %s219_s2, 256  ;;  %p358_p2 = scmp.lt.s32.totalorder %s219_s2, %s219_s2 }
  0x2c   :  { %v57_v11 = vpack.c.bf16 %v56_v10, %v55_v9  ;;  %v240_v37 = vld [vmem:[#allocation7 + $0x1] ss:$0 sm:$0xff]  ;;  %v241_v41 = vld [vmem:[#allocation7 + $0x2] ss:$0 sm:$0xff]  ;;  %p354_p1 = scmp.ne.s32.totalorder %s219_s2, %s353_s30  ;;  %p359_p3 = scmp.lt.s32.totalorder %s353_s30, %s353_s30 }
  0x2e   :  { %254 = vmatpush3.bf16.msra.mxu0 %v282_v2  ;;  %p360_p4 = por %p359_p3, %p358_p2 }
  0x2f   :  { %255 = vmatprep.subr.bf16.mxu0 %v386_v0 }
  0x30   :  { %p361_p5 = pnand %p360_p4, %p354_p1 }
  0x32   :  { %256 = vmatpush3.bf16.msra.mxu0 %v283_v3 }
  0x33   :  { %257 = vmatprep.subr.bf16.mxu0 %v386_v0 }
  0x36   :  { %258 = vmatpush3.bf16.msra.mxu0 %v284_v4 }
  0x37   :  { %259 = vmatprep.subr.bf16.mxu0 %v386_v0 }
  0x3a   :  { %260 = vmatpush3.bf16.msra.mxu0 %v285_v5 }
  0x3b   :  { %261 = vmatprep.subr.bf16.mxu0 %v386_v0 }
  0x3e   :  { %262 = vmatpush3.bf16.msra.mxu0 %v286_v6 }
  0x3f   :  { %263 = vmatprep.subr.bf16.mxu0 %v386_v0 }
  0x42   :  { %264 = vmatpush3.bf16.msra.mxu0 %v287_v7 }
  0x43   :  { %265 = vmatprep.subr.bf16.mxu0 %v386_v0 }
  0x46   :  { %266 = vmatpush3.bf16.msra.mxu0 %v288_v8 }
  0x49   :  { %268 = vmatmul.mubr.bf16.vlgmr.msra.gmra.mxu0 %v57_v11 }
 0x109   :  { %v161_v13 = vpop.f32.mrf.mxu0 }
 0x10a   :  { %v162_v14 = vadd.f32 %v231_v12, %v161_v13 }
 0x10b   :  { %v269_v15 = vpop.f32.mrf.mxu0 }
 0x10c   :  { %v168_v16 = vmax.f32 %v162_v14, 0.0 }
 0x10d   :  { %v164_v17 = vpop.f32.mrf.mxu0 }
 0x10e   :  { %v165_v18 = vadd.f32 %v231_v12, %v164_v17  ;;  %172 = vadd.xlane.f32.xlu0 %v168_v16  ;;  %v179_v19 = vmul.f32 %v168_v16, %v168_v16 }
 0x10f   :  { %v270_v20 = vpop.f32.mrf.mxu0 }
 0x110   :  { %v169_v21 = vmax.f32 %v165_v18, 0.0  ;;  %181 = vadd.xlane.f32.xlu1 %v179_v19 }
 0x112   :  { %174 = vadd.xlane.f32.xlu0 %v169_v21  ;;  %v180_v22 = vmul.f32 %v169_v21, %v169_v21 }
 0x114   :  { %183 = vadd.xlane.f32.xlu1 %v180_v22 }
 0x197   :  { %v173_v23 = vpop.xlane.xlu0 %172 }
 0x198   :  { %v177_v24 = vmul.f32 0.0078125, %v173_v23 }
 0x199   :  { %v182_v25 = vpop.xlane.xlu1 %181 }
 0x19a   :  { %v187_v26 = vmul.f32 %v177_v24, %v177_v24  ;;  %v185_v27 = vmul.f32 0.0078125, %v182_v25  ;;  %v201_v39 = vsub.f32 %v168_v16, %v177_v24 }
 0x19b   :  { %v175_v28 = vpop.xlane.xlu0 %174 }
 0x19c   :  { %v189_v29 = vsub.f32 %v185_v27, %v187_v26  ;;  %v178_v30 = vmul.f32 0.0078125, %v175_v28 }
 0x19d   :  { %v184_v31 = vpop.xlane.xlu1 %183 }
 0x19e   :  { %v191_v32 = vadd.f32 1e-05, %v189_v29  ;;  %v188_v33 = vmul.f32 %v178_v30, %v178_v30  ;;  %v186_v34 = vmul.f32 0.0078125, %v184_v31  ;;  %v202_v44 = vsub.f32 %v169_v21, %v178_v30 }
 0x1a0   :  { %289 = vrsqrt.f32 %v191_v32  ;;  %v190_v35 = vsub.f32 %v186_v34, %v188_v33 }
 0x1a2   :  { %v192_v36 = vadd.f32 1e-05, %v190_v35 }
 0x1a4   :  { %291 = vrsqrt.f32 %v192_v36 }
 0x1ad   :  { %v290_v38 = vpop.eup %289 }
 0x1ae   :  { %v199_v40 = vmul.f32 %v290_v38, %v240_v37 }
 0x1b0   :  { %v203_v42 = vmul.f32 %v201_v39, %v199_v40 }
 0x1b1   :  { %v292_v43 = vpop.eup %291 }
 0x1b2   :  { %v200_v45 = vmul.f32 %v292_v43, %v240_v37  ;;  %v209_v46 = vadd.f32 %v241_v41, %v203_v42 }
 0x1b4   :  { %v204_v47 = vmul.f32 %v202_v44, %v200_v45  ;;  %211 = vst [vmem:[#allocation8] sm:$0xff] %v209_v46 }
 0x1b6   :  { %v210_v48 = vadd.f32 %v241_v41, %v204_v47 }
 0x1b8   :  { %212 = vst [vmem:[#allocation8 + $0x8] sm:$0xff] %v210_v48 }
 0x1b9   :  { %364 = shalt.err (!%p361_p5)
}
 0x1ba   :  { %224 = dma.vmem_to_hbm [thread:$0]  %s219_s2, 256, %s430_s3, [#allocation4], %s383_s22, %s383_s22, %s384_s23  }
 0x1bb   :  { %377 = dma.done.wait [#allocation4], 256  }
 0x1bc   :  { %378 = vsyncadd [#allocation4], 4294967040 }
 0x1bd   :  { %228 = vsyncpa [#allocation3], 1 }
 0x1be   :  { %229 = vsyncpa [#allocation6], 1 }
 0x1bf   :  { %230 = vsyncpa [#allocation4], 1 }

</bundles_post_ra>
